<compile_context>
chip_gen: v6e
topology: v6e:2x2x1
jax: 0.10.0
libtpu: 0.0.40
codegen_flags: <defaults>
</compile_context>

<pallas_src>
import numpy as np
import jax
import jax.numpy as jnp
from jax import lax
from jax.experimental import pallas as pl
from jax.experimental.pallas import tpu as pltpu


_BIAS_PAD = 8  # sublane alignment for the packed bias rows inside the weight slab


def _timestep_embed_kernel(ts_ref,   # VMEM int32 [B, 1]        clamped timesteps
                           pe_ref,   # VMEM f32   [max_len, D]  full pe table
                           wb_ref,   # VMEM f32   [2D+16, D]    packed w1 | b1 | w2 | b2
                           o_ref):   # VMEM f32   [1, B, D]     final (permuted) layout
    B = ts_ref.shape[0]
    max_len, D = pe_ref.shape

    # ---- Fused gather as a one-hot matmul: no manual DMAs, no dynamic indexing. ----
    ts = ts_ref[...]                                                    # [B, 1] int32
    iota = lax.broadcasted_iota(jnp.int32, (B, max_len), 1)             # [B, max_len]
    onehot = (iota == ts).astype(pe_ref.dtype)                          # [B, max_len]
    x = jnp.dot(onehot, pe_ref[...], preferred_element_type=jnp.float32)  # [B, D]

    # ---- Unpack the single weight slab (static, sublane-aligned slices -> views). ----
    w1 = wb_ref[pl.ds(0, D), :]                                         # [D, D]
    b1 = wb_ref[pl.ds(D, 1), :]                                         # [1, D]
    w2 = wb_ref[pl.ds(D + _BIAS_PAD, D), :]                             # [D, D]
    b2 = wb_ref[pl.ds(2 * D + _BIAS_PAD, 1), :]                         # [1, D]

    # ---- MLP: Linear -> SiLU -> Linear (MXU matmuls, f32 accumulation). ----
    h = jnp.dot(x, w1, preferred_element_type=jnp.float32) + b1
    h = h * jax.nn.sigmoid(h)                                           # SiLU
    out = jnp.dot(h, w2, preferred_element_type=jnp.float32) + b2

    # ---- Write directly in the final [1, B, D] layout (permute(1, 0, 2) folded in). ----
    o_ref[...] = out[None, :, :].astype(o_ref.dtype)


def pack_mlp_params(w1, b1, w2, b2):
    """Pack w1/b1/w2/b2 into one [2D+16, D] f32 slab with sublane-aligned offsets.

    Layout (rows):  [0, D)      -> w1           (w already transposed to (in, out))
                    [D, D+8)    -> b1 row + zero padding
                    [D+8, 2D+8) -> w2
                    [2D+8, ...) -> b2 row + zero padding
    Call this ONCE at init time (it is a parameter transform, not per-step work).
    """
    D = w1.shape[0]
    assert D % 8 == 0, "latent_dim must be a multiple of 8 for aligned slab slicing"

    def pad_bias(b):
        b = b.reshape(1, D).astype(jnp.float32)
        return jnp.concatenate([b, jnp.zeros((_BIAS_PAD - 1, D), jnp.float32)], axis=0)

    return jnp.concatenate(
        [w1.astype(jnp.float32), pad_bias(b1), w2.astype(jnp.float32), pad_bias(b2)],
        axis=0)                                                         # [2D+16, D]


def timestep_embedder_forward(timesteps, pe_table, wb_packed):
    """Full forward of TimestepEmbedder.

    timesteps: int32 [B]
    pe_table:  f32 [max_len, 1, D]  (standard sinusoidal PE buffer, PyTorch layout)
    wb_packed: f32 [2D+16, D]       (from pack_mlp_params; weights stored as (in, out))
    returns:   f32 [1, B, D]  == MLP(pe[timesteps]).permute(1, 0, 2)
    """
    B = timesteps.shape[0]
    max_len, _, D = pe_table.shape
    pe2d = pe_table.reshape(max_len, D)          # drop the size-1 middle dim (metadata only)
    wb_rows = wb_packed.shape[0]

    # Defined behavior for out-of-range timesteps (PyTorch would raise).
    ts2d = jnp.clip(timesteps.astype(jnp.int32), 0, max_len - 1).reshape(B, 1)

    cost = pl.CostEstimate(
        flops=2 * B * max_len * D            # one-hot gather matmul
              + 2 * 2 * B * D * D            # two MLP matmuls
              + 4 * B * D,                   # bias adds + SiLU mul
        transcendentals=B * D,               # sigmoid
        bytes_accessed=4 * (B + max_len * D + wb_rows * D + B * D),
    )

    return pl.pallas_call(
        _timestep_embed_kernel,
        out_shape=jax.ShapeDtypeStruct((1, B, D), jnp.float32),
        grid=(1,),
        in_specs=[
            pl.BlockSpec((B, 1), lambda i: (0, 0)),          # timesteps
            pl.BlockSpec((max_len, D), lambda i: (0, 0)),    # whole pe table -> VMEM once
            pl.BlockSpec((wb_rows, D), lambda i: (0, 0)),    # packed weight slab -> VMEM once
        ],
        out_specs=pl.BlockSpec((1, B, D), lambda i: (0, 0, 0)),
        compiler_params=pltpu.CompilerParams(
            dimension_semantics=("arbitrary",)),             # no megacore split on v7x
        cost_estimate=cost,
    )(ts2d, pe2d, wb_packed)


def make_sinusoidal_pe(max_len, d_model):
    """Standard sinusoidal positional encoding table, shape [max_len, 1, d_model]."""
    position = np.arange(max_len)[:, None].astype(np.float64)
    div_term = np.exp(np.arange(0, d_model, 2).astype(np.float64) *
                      (-np.log(10000.0) / d_model))
    pe = np.zeros((max_len, d_model), dtype=np.float64)
    pe[:, 0::2] = np.sin(position * div_term)
    pe[:, 1::2] = np.cos(position * div_term)
    return jnp.asarray(pe[:, None, :], dtype=jnp.float32)  # [max_len, 1, D]


if __name__ == "__main__":
    latent_dim = 32
    max_len = 64
    batch = 8

    key = jax.random.PRNGKey(0)
    k1, k2, k3, k4, kt = jax.random.split(key, 5)

    # Deterministic parameter init (nn.Linear-like uniform bound 1/sqrt(fan_in)),
    # stored already transposed to (in, out) so the kernel does plain x @ W.
    bound = 1.0 / np.sqrt(latent_dim)
    w1 = jax.random.uniform(k1, (latent_dim, latent_dim), jnp.float32, -bound, bound)
    b1 = jax.random.uniform(k2, (1, latent_dim), jnp.float32, -bound, bound)
    w2 = jax.random.uniform(k3, (latent_dim, latent_dim), jnp.float32, -bound, bound)
    b2 = jax.random.uniform(k4, (1, latent_dim), jnp.float32, -bound, bound)

    wb = pack_mlp_params(w1, b1, w2, b2)                                # packed ONCE
    pe_table = make_sinusoidal_pe(max_len, latent_dim)                  # [max_len, 1, D]
    timesteps = jax.random.randint(kt, (batch,), 0, max_len, dtype=jnp.int32)

    out = timestep_embedder_forward(timesteps, pe_table, wb)
    out = jax.block_until_ready(out)

    # Reference in plain JAX for sanity check.
    gathered = jnp.take(pe_table, timesteps, axis=0)                    # [B, 1, D]
    h_ref = gathered @ w1 + b1
    h_ref = h_ref * jax.nn.sigmoid(h_ref)
    ref = jnp.transpose(h_ref @ w2 + b2, (1, 0, 2))                     # [1, B, D]

    assert out.shape == (1, batch, latent_dim), out.shape
    np.testing.assert_allclose(np.asarray(out), np.asarray(ref), rtol=1e-5, atol=1e-5)
    print("KERNEL_OK")
</pallas_src>

<mosaic_0001>
module attributes {stable_mosaic.version = 11 : i64} {
  func.func @_timestep_embed_kernel(%arg0: i32, %arg1: memref<8x1xi32, #tpu.memory_space<vmem>>, %arg2: memref<64x32xf32, #tpu.memory_space<vmem>>, %arg3: memref<80x32xf32, #tpu.memory_space<vmem>>, %arg4: memref<1x8x32xf32, #tpu.memory_space<vmem>>) attributes {dimension_semantics = [#tpu.dimension_semantics<arbitrary>], iteration_bounds = array<i64: 1>, scalar_prefetch = 0 : i64, scratch_operands = 0 : i64, tpu.core_type = #tpu.core_type<tc>, window_params = [{pipeline_mode = #tpu.pipeline_mode<synchronous>, transform_indices = @transform_0, window_bounds = array<i64: 8, 1>}, {pipeline_mode = #tpu.pipeline_mode<synchronous>, transform_indices = @transform_1, window_bounds = array<i64: 64, 32>}, {pipeline_mode = #tpu.pipeline_mode<synchronous>, transform_indices = @transform_2, window_bounds = array<i64: 80, 32>}, {pipeline_mode = #tpu.pipeline_mode<synchronous>, transform_indices = @transform_3, window_bounds = array<i64: 1, 8, 32>}]} {
    %c0 = arith.constant 0 : index
    %c0_0 = arith.constant 0 : index
    %0 = vector.load %arg1[%c0, %c0_0] : memref<8x1xi32, #tpu.memory_space<vmem>>, vector<8x1xi32>
    %1 = tpu.iota {dimensions = array<i32: 1>} : vector<8x64xi32>
    %2 = vector.broadcast %0 : vector<8x1xi32> to vector<8x64xi32>
    %3 = arith.cmpi eq, %1, %2 : vector<8x64xi32>
    %4 = arith.extui %3 : vector<8x64xi1> to vector<8x64xi32>
    %5 = arith.sitofp %4 : vector<8x64xi32> to vector<8x64xf32>
    %c0_1 = arith.constant 0 : index
    %c0_2 = arith.constant 0 : index
    %6 = vector.load %arg2[%c0_1, %c0_2] : memref<64x32xf32, #tpu.memory_space<vmem>>, vector<64x32xf32>
    %cst = arith.constant dense<0.000000e+00> : vector<8x32xf32>
    %7 = tpu.matmul %5, %6, %cst {dimension_numbers = #tpu.dot_dimension_numbers<[1], [0], [0], [1], [0, 0, 1, 1], [], []>} : vector<8x64xf32>, vector<64x32xf32>, vector<8x32xf32> -> vector<8x32xf32>
    %c0_3 = arith.constant 0 : index
    %c0_4 = arith.constant 0 : index
    %8 = vector.load %arg3[%c0_3, %c0_4] : memref<80x32xf32, #tpu.memory_space<vmem>>, vector<32x32xf32>
    %c32 = arith.constant 32 : index
    %c0_5 = arith.constant 0 : index
    %9 = vector.load %arg3[%c32, %c0_5] : memref<80x32xf32, #tpu.memory_space<vmem>>, vector<1x32xf32>
    %c40 = arith.constant 40 : index
    %c0_6 = arith.constant 0 : index
    %10 = vector.load %arg3[%c40, %c0_6] : memref<80x32xf32, #tpu.memory_space<vmem>>, vector<32x32xf32>
    %c72 = arith.constant 72 : index
    %c0_7 = arith.constant 0 : index
    %11 = vector.load %arg3[%c72, %c0_7] : memref<80x32xf32, #tpu.memory_space<vmem>>, vector<1x32xf32>
    %cst_8 = arith.constant dense<0.000000e+00> : vector<8x32xf32>
    %12 = tpu.matmul %7, %8, %cst_8 {dimension_numbers = #tpu.dot_dimension_numbers<[1], [0], [0], [1], [0, 0, 1, 1], [], []>} : vector<8x32xf32>, vector<32x32xf32>, vector<8x32xf32> -> vector<8x32xf32>
    %13 = vector.broadcast %9 : vector<1x32xf32> to vector<8x32xf32>
    %14 = arith.addf %12, %13 : vector<8x32xf32>
    %15 = arith.negf %14 : vector<8x32xf32>
    %16 = math.exp %15 : vector<8x32xf32>
    %cst_9 = arith.constant 1.000000e+00 : f32
    %17 = vector.broadcast %cst_9 : f32 to vector<8x32xf32>
    %18 = arith.addf %17, %16 : vector<8x32xf32>
    %19 = arith.divf %17, %18 : vector<8x32xf32>
    %20 = arith.mulf %14, %19 : vector<8x32xf32>
    %cst_10 = arith.constant dense<0.000000e+00> : vector<8x32xf32>
    %21 = tpu.matmul %20, %10, %cst_10 {dimension_numbers = #tpu.dot_dimension_numbers<[1], [0], [0], [1], [0, 0, 1, 1], [], []>} : vector<8x32xf32>, vector<32x32xf32>, vector<8x32xf32> -> vector<8x32xf32>
    %22 = vector.broadcast %11 : vector<1x32xf32> to vector<8x32xf32>
    %23 = arith.addf %21, %22 : vector<8x32xf32>
    %24 = vector.shape_cast %23 : vector<8x32xf32> to vector<1x8x32xf32>
    %c0_11 = arith.constant 0 : index
    %c0_12 = arith.constant 0 : index
    %c0_13 = arith.constant 0 : index
    %25 = vector.load %arg4[%c0_11, %c0_12, %c0_13] : memref<1x8x32xf32, #tpu.memory_space<vmem>>, vector<1x8x32xf32>
    tpu.vector_store %arg4[%c0_11, %c0_12, %c0_13], %24 {strides = array<i32>} : memref<1x8x32xf32, #tpu.memory_space<vmem>>, vector<1x8x32xf32>,
    return
  }
  func.func @transform_0(%arg0: i32) -> (i32, i32) {
    %c0_i32 = arith.constant 0 : i32
    %c0_i32_0 = arith.constant 0 : i32
    %c0_i32_1 = arith.constant 0 : i32
    return %c0_i32, %c0_i32_0 : i32, i32
  }
  func.func @transform_1(%arg0: i32) -> (i32, i32) {
    %c0_i32 = arith.constant 0 : i32
    %c0_i32_0 = arith.constant 0 : i32
    %c0_i32_1 = arith.constant 0 : i32
    return %c0_i32, %c0_i32_0 : i32, i32
  }
  func.func @transform_2(%arg0: i32) -> (i32, i32) {
    %c0_i32 = arith.constant 0 : i32
    %c0_i32_0 = arith.constant 0 : i32
    %c0_i32_1 = arith.constant 0 : i32
    return %c0_i32, %c0_i32_0 : i32, i32
  }
  func.func @transform_3(%arg0: i32) -> (i32, i32, i32) {
    %c0_i32 = arith.constant 0 : i32
    %c0_i32_0 = arith.constant 0 : i32
    %c0_i32_1 = arith.constant 0 : i32
    %c0_i32_2 = arith.constant 0 : i32
    return %c0_i32, %c0_i32_0, %c0_i32_1 : i32, i32, i32
  }
}

</mosaic_0001>

<bundles_post_ra>
// kernel: tpu_custom_call.1
= control target key start
LH: loop header
LB: loop body
LE: loop exit
PB: predicated region body
PF: predicated region fallthrough
CT: control target
= control target key end

     0   :  { %v391_v2 = vmov 0   ;;  %v392_v3 = vmov 0.0   ;;  %vm393_vm0 = vmmov 0   ;;  %s481_s0 = inlined_call_operand.vmem [shape: s32[8,1], index: 0, kind: input, shape index: {}]   ;;  %s482_s1 = inlined_call_operand.vmem [shape: f32[64,32], index: 1, kind: input, shape index: {}]   ;;  %s483_s2 = inlined_call_operand.vmem [shape: f32[80,32], index: 2, kind: input, shape index: {}]   ;;  %s484_s3 = inlined_call_operand.hbm [shape: f32[1,8,32], index: 3, kind: output, shape index: {}]  }
   0x1   :  { %v15_v0 = vld [vmem:[%s481_s0] sm:$0xff]  ;;  %v31_v1 = vld [vmem:[%s482_s1 + $0x38] sm:$0xff]  ;;  %364 = vset.pattern.permute.xlu0 %v391_v2  ;;  %319 = vmatprep.subr.mxu0 %v392_v3  ;;  %v30_v4 = vld [vmem:[%s482_s1 + $0x30] sm:$0xff] }
   0x2   :  { %19 = vperm.xlu0 %364, %v15_v0   ;;  %320 = vmatpush3.msra.mxu0 %v31_v1  ;;  %v29_v5 = vld [vmem:[%s482_s1 + $0x28] sm:$0xff]  ;;  %v109_v6 = vld [vmem:[%s483_s2 + $0x18] sm:$0xff]  ;;  %v108_v7 = vld [vmem:[%s483_s2 + $0x10] sm:$0xff] }
   0x3   :  { %321 = vmatprep.subr.mxu0 %v392_v3  ;;  %335 = vmatprep.mubr.msk.f32.mxu0 %vm393_vm0, %v392_v3 }
   0x4   :  { %322 = vmatpush3.msra.mxu0 %v30_v4  ;;  %338 = vmatprep.subr.mxu1 %v392_v3 }
   0x5   :  { %8 = vsyncpa [#allocation3], 0  ;;  %323 = vmatprep.subr.mxu0 %v392_v3  ;;  %v28_v8 = vld [vmem:[%s482_s1 + $0x20] sm:$0xff]  ;;  %339 = vmatpush3.msra.mxu1 %v109_v6  ;;  %v107_v9 = vld [vmem:[%s483_s2 + $0x8] sm:$0xff]  ;;  %v16_v14 = vlaneseq  ;;  %vm32_vm1 = vcmask 523264   ;;  %vm120_vm3 = vcmask 261120  }
   0x6   :  { %324 = vmatpush3.msra.mxu0 %v29_v5  ;;  %340 = vmatprep.subr.mxu1 %v392_v3  ;;  %v27_v10 = vld [vmem:[%s482_s1 + $0x18] sm:$0xff]  ;;  %v26_v11 = vld [vmem:[%s482_s1 + $0x10] sm:$0xff]  ;;  %v25_v12 = vld [vmem:[%s482_s1 + $0x8] sm:$0xff]  ;;  %s394_s20 = smov [#allocation2]  }
   0x7   :  { %325 = vmatprep.subr.mxu0 %v392_v3  ;;  %341 = vmatpush3.msra.mxu1 %v108_v7  ;;  %v24_v13 = vld [vmem:[%s482_s1] sm:$0xff]  ;;  %v17_v15 = vand.u32 127, %v16_v14  ;;  %v113_v22 = vld [vmem:[%s483_s2 + $0x38] sm:$0xff]  ;;  %v112_v23 = vld [vmem:[%s483_s2 + $0x30] sm:$0xff]  ;;  %s285_s21 = sshll.u32 %s394_s20, 4  ;;  %s286_s21 = int_to_ptr.vmem [resolvable:$true] %s285_s21 }
   0x8   :  { %326 = vmatpush3.msra.mxu0 %v28_v8  ;;  %342 = vmatprep.subr.mxu1 %v392_v3  ;;  %v106_v18 = vld [vmem:[%s483_s2] sm:$0xff]  ;;  %v111_v24 = vld [vmem:[%s483_s2 + $0x28] sm:$0xff]  ;;  %s369_s22 = scalar_lea.vmem %s286_s21, 128  ;;  %p374_p1 = scmp.lt.s32.totalorder %s286_s21, %s286_s21 }
   0x9   :  { %327 = vmatprep.subr.mxu0 %v392_v3  ;;  %343 = vmatpush3.msra.mxu1 %v107_v9  ;;  %v114_v21 = vld [vmem:[%s483_s2 + $0x40] sm:$0xff]  ;;  %v298_v34 = vld [vmem:[%s483_s2 + $0x48] ss:$0 sm:$0xff]  ;;  %p370_p0 = scmp.ne.s32.totalorder %s286_s21, %s369_s22  ;;  %p375_p2 = scmp.lt.s32.totalorder %s369_s22, %s369_s22 }
   0xa   :  { %328 = vmatpush3.msra.mxu0 %v27_v10  ;;  %344 = vmatprep.subr.mxu1 %v392_v3  ;;  %v295_v25 = vld [vmem:[%s483_s2 + $0x20] ss:$0 sm:$0xff] }
   0xb   :  { %329 = vmatprep.subr.mxu0 %v392_v3  ;;  %346 = vmatprep.mubr.msk.f32.mxu1 %vm393_vm0, %v392_v3  ;;  %p376_p3 = por %p375_p2, %p374_p1 }
   0xc   :  { %330 = vmatpush3.msra.mxu0 %v26_v11  ;;  %345 = vmatpush3.msra.mxu1 %v106_v18 }
   0xd   :  { %331 = vmatprep.subr.mxu0 %v392_v3  ;;  %349 = vmatprep.subr.mxu1 %v392_v3  ;;  %p377_p4 = pnand %p376_p3, %p370_p0 }
   0xe   :  { %332 = vmatpush3.msra.mxu0 %v25_v12 }
   0xf   :  { %333 = vmatprep.subr.mxu0 %v392_v3 }
  0x10   :  { %334 = vmatpush3.msra.mxu0 %v24_v13 }
  0x7d   :  { %v20_v16 = vpop.permute.xlu0 %19 }
  0x7e   :  { %vm21_vm2 = vcmp.eq.s32.totalorder %v17_v15, %v20_v16 }
  0x7f   :  { %v293_v17 = vsel %vm21_vm2, 1.0, %v392_v3 }
  0x80   :  { %336 = vmatmul.mubr.msk.f32.vlgmr.msra.gmra.mxu0 %vm32_vm1, %v293_v17 }
 0x140   :  { %v102_v19 = vpop.f32.mrf.mxu0 }
 0x141   :  { %347 = vmatmul.mubr.msk.f32.vlgmr.msra.gmra.mxu1 %vm120_vm3, %v102_v19 }
 0x142   :  { %v337_v20 = vpop.f32.mrf.mxu0  ;;  %357 = vmatprep.mubr.msk.f32.mxu1 %vm393_vm0, %v392_v3  ;;  %350 = vmatpush3.msra.mxu1 %v114_v21 }
 0x143   :  { %351 = vmatprep.subr.mxu1 %v392_v3 }
 0x144   :  { %352 = vmatpush3.msra.mxu1 %v113_v22 }
 0x145   :  { %353 = vmatprep.subr.mxu1 %v392_v3 }
 0x146   :  { %354 = vmatpush3.msra.mxu1 %v112_v23 }
 0x147   :  { %355 = vmatprep.subr.mxu1 %v392_v3 }
 0x148   :  { %356 = vmatpush3.msra.mxu1 %v111_v24 }
 0x201   :  { %v190_v26 = vpop.f32.mrf.mxu1 }
 0x202   :  { %v191_v27 = vadd.f32 %v295_v25, %v190_v26 }
 0x203   :  { %v348_v28 = vpop.f32.mrf.mxu1 }
 0x204   :  { %v297_v29 = vmul.f32 -1.442695, %v191_v27 }
 0x206   :  { %365 = vpow2.f32 %v297_v29 }
 0x213   :  { %v366_v30 = vpop.eup %365 }
 0x214   :  { %v197_v31 = vadd.f32 1.0, %v366_v30 }
 0x216   :  { %367 = vrcp.f32 %v197_v31 }
 0x223   :  { %v368_v32 = vpop.eup %367 }
 0x224   :  { %v200_v33 = vmul.f32 %v368_v32, %v191_v27 }
 0x226   :  { %358 = vmatmul.mubr.msk.f32.vlgmr.msra.gmra.mxu1 %vm120_vm3, %v200_v33 }
 0x2e6   :  { %v274_v35 = vpop.f32.mrf.mxu1 }
 0x2e7   :  { %v275_v36 = vadd.f32 %v298_v34, %v274_v35 }
 0x2e8   :  { %v359_v37 = vpop.f32.mrf.mxu1 }
 0x2e9   :  { %278 = vst.msk [vmem:[#allocation2] sm:$0xff] %vm120_vm3, %v275_v36 }
 0x2ea   :  { %380 = shalt.err (!%p377_p4)
}
 0x2eb   :  { %288 = dma.vmem_to_hbm [thread:$0]  %s286_s21, 128, %s484_s3, [#allocation3]  }
 0x2ec   :  { %389 = dma.done.wait [#allocation3], 128  }
 0x2ed   :  { %390 = vsyncadd [#allocation3], 4294967168 }
 0x2ee   :  { %292 = vsyncpa [#allocation3], 1 }

</bundles_post_ra>
